<compile_context>
chip_gen: v6e
topology: v6e:2x2x1
jax: 0.10.0
libtpu: 0.0.40
codegen_flags: <defaults>
</compile_context>

<pallas_src>
import jax
import jax.numpy as jnp
import numpy as np
from jax.experimental import pallas as pl
from jax.experimental.pallas import tpu as pltpu


def _round_up(x, m):
    return ((x + m - 1) // m) * m


def _pfn_concat_kernel(x_ref, w_ref, b_ref, out_ref):
    # x_ref:   (TN*P, Cin)   pillar tile, flattened over points (input dtype)
    # w_ref:   (Cin, Cout)   BN-scale-folded weight, same dtype as x
    # b_ref:   (1, Cout)     folded BN bias (or linear bias / zeros), f32
    # out_ref: (TN, P, 2*Cout)
    tn, p, two_cout = out_ref.shape
    cout = two_cout // 2

    # Single 2-D MXU matmul over the whole pillar tile; f32 accumulation.
    y2d = jnp.dot(x_ref[...], w_ref[...], preferred_element_type=jnp.float32)
    y2d = jnp.maximum(y2d + b_ref[...], 0.0)                 # bias + ReLU (f32, VPU)

    y = y2d.reshape(tn, p, cout)
    y_max = jnp.max(y, axis=1, keepdims=True)                # (TN, 1, Cout)

    out_ref[:, :, 0:cout] = y.astype(out_ref.dtype)
    out_ref[:, :, cout:two_cout] = jnp.broadcast_to(
        y_max, (tn, p, cout)).astype(out_ref.dtype)


def _pfn_split_kernel(x_ref, w_ref, b_ref, y_ref, ymax_ref):
    # Same math, but no redundant broadcast-max writeback:
    # y_ref:    (TN, P, Cout)   per-point features
    # ymax_ref: (TN, Cout)      per-pillar max
    tn, p, cout = y_ref.shape
    y2d = jnp.dot(x_ref[...], w_ref[...], preferred_element_type=jnp.float32)
    y2d = jnp.maximum(y2d + b_ref[...], 0.0)
    y = y2d.reshape(tn, p, cout)
    y_ref[...] = y.astype(y_ref.dtype)
    ymax_ref[...] = jnp.max(y, axis=1).astype(ymax_ref.dtype)


def _pfn_last_kernel(x_ref, w_ref, b_ref, out_ref):
    # x_ref:   (TN*P, Cin)
    # out_ref: (TN, Cout)   (size-1 point axis dropped; restored in wrapper)
    tn, cout = out_ref.shape
    p = x_ref.shape[0] // tn
    y2d = jnp.dot(x_ref[...], w_ref[...], preferred_element_type=jnp.float32)
    y2d = jnp.maximum(y2d + b_ref[...], 0.0)
    out_ref[...] = jnp.max(y2d.reshape(tn, p, cout), axis=1).astype(out_ref.dtype)


def _pick_tile_n(n, p, cout, in_itemsize, out_itemsize,
                 last_layer, concat_output, tile_n):
    """Pick a pillar-tile size from a VMEM budget, multiple of 8, >= 2 grid steps."""
    if tile_n is None:
        budget = 40 * 1024 * 1024                 # double-buffered block budget
        x_row = p * 128 * in_itemsize             # Cin (tiny) lane-pads to 128
        if last_layer:
            out_row = _round_up(cout, 128) * out_itemsize
        elif concat_output:
            out_row = p * _round_up(2 * cout, 128) * out_itemsize
        else:
            out_row = (p * _round_up(cout, 128)
                       + _round_up(cout, 128)) * out_itemsize
        per_pillar = 2 * (x_row + out_row)        # x2: double buffering
        tile_n = min(512, budget // max(per_pillar, 1))
    # >= 2 grid steps when possible (v7x has 2 TensorCores / chip) and a
    # multiple of 8 sublanes.
    tile_n = max(8, min(int(tile_n), pl.cdiv(n, 2 * 8) * 8))
    return max(8, (tile_n // 8) * 8)


def pfn_layer(inputs, weight_t, scale=None, bias=None, *,
              last_layer=False, tile_n=None, out_dtype=None,
              concat_output=True):
    """PFNLayer forward.

    inputs:   (N, P, Cin)
    weight_t: (Cin, Cout)  == nn.Linear.weight.T
    scale:    (Cout,)  folded BN scale (None when use_norm=False)
    bias:     (Cout,)  folded BN bias / linear bias (None -> zeros)

    Returns (module semantics):
      last_layer=True                     -> (N, 1, Cout)
      last_layer=False, concat_output=True  -> (N, P, 2*Cout)
      last_layer=False, concat_output=False -> (y (N,P,Cout), y_max (N,1,Cout))
        (fast path: the consumer does the broadcast / fuses it).
    """
    n, p, cin = inputs.shape
    cout = weight_t.shape[1]
    in_dtype = inputs.dtype
    if out_dtype is None:
        out_dtype = in_dtype

    # Fold BN scale into the weight (f32), then cast to the input dtype so the
    # MXU consumes bf16 natively when inputs are bf16 (no in-kernel casts).
    w = weight_t.astype(jnp.float32)
    if scale is not None:
        w = w * scale.reshape(1, cout).astype(jnp.float32)
    w = w.astype(in_dtype)
    if bias is None:
        b = jnp.zeros((1, cout), jnp.float32)
    else:
        b = bias.reshape(1, cout).astype(jnp.float32)

    in_itemsize = jnp.dtype(in_dtype).itemsize
    out_itemsize = jnp.dtype(out_dtype).itemsize
    tile_n = _pick_tile_n(n, p, cout, in_itemsize, out_itemsize,
                          last_layer, concat_output, tile_n)
    num_tiles = pl.cdiv(n, tile_n)
    n_pad = num_tiles * tile_n
    if n_pad != n:
        inputs = jnp.pad(inputs, ((0, n_pad - n), (0, 0), (0, 0)))

    # Free contiguous reshape -> a single 2-D matmul per grid step.
    x2d = inputs.reshape(n_pad * p, cin)

    in_specs = [
        pl.BlockSpec((tile_n * p, cin), lambda i: (i, 0)),   # pillar tile (2-D)
        pl.BlockSpec((cin, cout), lambda i: (0, 0)),          # full (scaled) weight
        pl.BlockSpec((1, cout), lambda i: (0, 0)),            # bias
    ]
    cp = pltpu.CompilerParams(
        dimension_semantics=("parallel",),       # megacore-shard pillar tiles
        vmem_limit_bytes=48 * 1024 * 1024,       # > v5e 16MiB default, safe on v7x 64MiB
    )

    flops = 2 * n_pad * p * cin * cout
    in_bytes = int(x2d.size) * in_itemsize + int(w.size) * in_itemsize + int(b.size) * 4

    if last_layer:
        out_bytes = n_pad * cout * out_itemsize
        ce = pl.CostEstimate(flops=flops, transcendentals=0,
                             bytes_accessed=in_bytes + out_bytes)
        out = pl.pallas_call(
            _pfn_last_kernel,
            out_shape=jax.ShapeDtypeStruct((n_pad, cout), out_dtype),
            grid=(num_tiles,),
            in_specs=in_specs,
            out_specs=pl.BlockSpec((tile_n, cout), lambda i: (i, 0)),
            compiler_params=cp,
            cost_estimate=ce,
        )(x2d, w, b)
        return out[:n].reshape(n, 1, cout)

    if concat_output:
        out_bytes = n_pad * p * 2 * cout * out_itemsize
        ce = pl.CostEstimate(flops=flops, transcendentals=0,
                             bytes_accessed=in_bytes + out_bytes)
        out = pl.pallas_call(
            _pfn_concat_kernel,
            out_shape=jax.ShapeDtypeStruct((n_pad, p, 2 * cout), out_dtype),
            grid=(num_tiles,),
            in_specs=in_specs,
            out_specs=pl.BlockSpec((tile_n, p, 2 * cout), lambda i: (i, 0, 0)),
            compiler_params=cp,
            cost_estimate=ce,
        )(x2d, w, b)
        return out[:n]

    # Split-output fast path: no P-fold redundant broadcast writeback.
    out_bytes = (n_pad * p * cout + n_pad * cout) * out_itemsize
    ce = pl.CostEstimate(flops=flops, transcendentals=0,
                         bytes_accessed=in_bytes + out_bytes)
    y, y_max = pl.pallas_call(
        _pfn_split_kernel,
        out_shape=(jax.ShapeDtypeStruct((n_pad, p, cout), out_dtype),
                   jax.ShapeDtypeStruct((n_pad, cout), out_dtype)),
        grid=(num_tiles,),
        in_specs=in_specs,
        out_specs=(pl.BlockSpec((tile_n, p, cout), lambda i: (i, 0, 0)),
                   pl.BlockSpec((tile_n, cout), lambda i: (i, 0))),
        compiler_params=cp,
        cost_estimate=ce,
    )(x2d, w, b)
    return y[:n], y_max[:n].reshape(n, 1, cout)


def _ref_pfn(inputs, w, scale, bias, last_layer):
    # Pure-JAX reference mirroring the PyTorch forward (eval-mode BN).
    x = inputs @ w.T
    x = x * scale + bias
    x = jnp.maximum(x, 0.0)
    x_max = jnp.max(x, axis=1, keepdims=True)
    if last_layer:
        return x_max
    return jnp.concatenate([x, jnp.broadcast_to(x_max, x.shape)], axis=-1)


if __name__ == "__main__":
    key = jax.random.PRNGKey(0)
    keys = jax.random.split(key, 12)

    # Shapes consistent with PFNLayer(in_channels=10, out_channels=64, use_norm=True).
    N, P, Cin, out_channels = 16, 32, 10, 64
    eps = 1e-3
    inputs = jax.random.normal(keys[0], (N, P, Cin), dtype=jnp.float32)

    def make_params(kw, kg, kb, km, kv, cout):
        w = 0.1 * jax.random.normal(kw, (cout, Cin), dtype=jnp.float32)  # nn.Linear weight
        gamma = 1.0 + 0.1 * jax.random.normal(kg, (cout,), dtype=jnp.float32)
        beta = 0.1 * jax.random.normal(kb, (cout,), dtype=jnp.float32)
        r_mean = 0.1 * jax.random.normal(km, (cout,), dtype=jnp.float32)
        r_var = jnp.abs(1.0 + 0.1 * jax.random.normal(kv, (cout,), dtype=jnp.float32))
        scale = gamma / jnp.sqrt(r_var + eps)
        bias = beta - r_mean * scale
        return w, scale, bias

    # --- non-last layer: effective C_out = 64 // 2 = 32, f32, module-semantics concat ---
    Cout = out_channels // 2
    w1, s1, b1 = make_params(keys[1], keys[2], keys[3], keys[4], keys[5], Cout)
    out1 = jax.block_until_ready(pfn_layer(inputs, w1.T, s1, b1, last_layer=False))
    ref1 = _ref_pfn(inputs, w1, s1, b1, last_layer=False)
    np.testing.assert_allclose(np.asarray(out1), np.asarray(ref1), rtol=1e-5, atol=1e-5)

    # --- same layer, split outputs (no redundant broadcast writeback) ---
    y1, ymax1 = jax.block_until_ready(
        pfn_layer(inputs, w1.T, s1, b1, last_layer=False, concat_output=False))
    rec1 = jnp.concatenate([y1, jnp.broadcast_to(ymax1, y1.shape)], axis=-1)
    np.testing.assert_allclose(np.asarray(rec1), np.asarray(ref1), rtol=1e-5, atol=1e-5)

    # --- same layer, bf16 I/O (native bf16 MXU, f32 accumulation, bf16 stores) ---
    x_bf16 = inputs.astype(jnp.bfloat16)
    out_bf = jax.block_until_ready(pfn_layer(x_bf16, w1.T, s1, b1, last_layer=False))
    w1_folded_bf = (w1.T.astype(jnp.float32) * s1.reshape(1, -1)).astype(jnp.bfloat16)
    y_ref = jnp.maximum(
        x_bf16.astype(jnp.float32) @ w1_folded_bf.astype(jnp.float32) + b1, 0.0)
    ymax_ref = jnp.max(y_ref, axis=1, keepdims=True)
    ref_bf = jnp.concatenate([y_ref, jnp.broadcast_to(ymax_ref, y_ref.shape)], axis=-1)
    np.testing.assert_allclose(np.asarray(out_bf.astype(jnp.float32)),
                               np.asarray(ref_bf), rtol=1e-2, atol=1e-2)

    # --- last layer (full C_out = 64), ragged pillar count to exercise padding ---
    N2 = 13
    inputs2 = inputs[:N2]
    w2, s2, b2 = make_params(keys[6], keys[7], keys[8], keys[9], keys[10], out_channels)
    out2 = jax.block_until_ready(pfn_layer(inputs2, w2.T, s2, b2, last_layer=True))
    ref2 = _ref_pfn(inputs2, w2, s2, b2, last_layer=True)
    np.testing.assert_allclose(np.asarray(out2), np.asarray(ref2), rtol=1e-5, atol=1e-5)

    print("KERNEL_OK")
</pallas_src>

<mosaic_0001>
module attributes {stable_mosaic.version = 11 : i64} {
  func.func @_pfn_concat_kernel(%arg0: i32, %arg1: memref<256x10xf32, #tpu.memory_space<vmem>>, %arg2: memref<10x32xf32, #tpu.memory_space<vmem>>, %arg3: memref<1x32xf32, #tpu.memory_space<vmem>>, %arg4: memref<8x32x64xf32, #tpu.memory_space<vmem>>) attributes {dimension_semantics = [#tpu.dimension_semantics<parallel>], iteration_bounds = array<i64: 2>, scalar_prefetch = 0 : i64, scratch_operands = 0 : i64, tpu.core_type = #tpu.core_type<tc>, window_params = [{transform_indices = @transform_0, window_bounds = array<i64: 256, 10>}, {pipeline_mode = #tpu.pipeline_mode<synchronous>, transform_indices = @transform_1, window_bounds = array<i64: 10, 32>}, {pipeline_mode = #tpu.pipeline_mode<synchronous>, transform_indices = @transform_2, window_bounds = array<i64: 1, 32>}, {transform_indices = @transform_3, window_bounds = array<i64: 8, 32, 64>}]} {
    %c0 = arith.constant 0 : index
    %c0_0 = arith.constant 0 : index
    %0 = vector.load %arg1[%c0, %c0_0] : memref<256x10xf32, #tpu.memory_space<vmem>>, vector<256x10xf32>
    %c0_1 = arith.constant 0 : index
    %c0_2 = arith.constant 0 : index
    %1 = vector.load %arg2[%c0_1, %c0_2] : memref<10x32xf32, #tpu.memory_space<vmem>>, vector<10x32xf32>
    %cst = arith.constant dense<0.000000e+00> : vector<256x32xf32>
    %2 = tpu.matmul %0, %1, %cst {dimension_numbers = #tpu.dot_dimension_numbers<[1], [0], [0], [1], [0, 0, 1, 1], [], []>} : vector<256x10xf32>, vector<10x32xf32>, vector<256x32xf32> -> vector<256x32xf32>
    %c0_3 = arith.constant 0 : index
    %c0_4 = arith.constant 0 : index
    %3 = vector.load %arg3[%c0_3, %c0_4] : memref<1x32xf32, #tpu.memory_space<vmem>>, vector<1x32xf32>
    %4 = vector.broadcast %3 : vector<1x32xf32> to vector<256x32xf32>
    %5 = arith.addf %2, %4 : vector<256x32xf32>
    %cst_5 = arith.constant 0.000000e+00 : f32
    %6 = vector.broadcast %cst_5 : f32 to vector<256x32xf32>
    %7 = arith.maximumf %5, %6 : vector<256x32xf32>
    %8 = vector.shape_cast %7 : vector<256x32xf32> to vector<8x32x32xf32>
    %cst_6 = arith.constant dense<0xFF800000> : vector<8x32xf32>
    %9 = vector.multi_reduction <maximumf>, %8, %cst_6 [1] : vector<8x32x32xf32> to vector<8x32xf32>
    %10 = vector.shape_cast %9 : vector<8x32xf32> to vector<8x1x32xf32>
    %c0_7 = arith.constant 0 : index
    %c0_8 = arith.constant 0 : index
    %c0_9 = arith.constant 0 : index
    %11 = vector.load %arg4[%c0_7, %c0_8, %c0_9] : memref<8x32x64xf32, #tpu.memory_space<vmem>>, vector<8x32x32xf32>
    tpu.vector_store %arg4[%c0_7, %c0_8, %c0_9], %8 {strides = array<i32>} : memref<8x32x64xf32, #tpu.memory_space<vmem>>, vector<8x32x32xf32>,
    %12 = vector.shape_cast %10 : vector<8x1x32xf32> to vector<8x1x32xf32>
    %13 = vector.broadcast %12 : vector<8x1x32xf32> to vector<8x32x32xf32>
    %c0_10 = arith.constant 0 : index
    %c0_11 = arith.constant 0 : index
    %c32 = arith.constant 32 : index
    %14 = vector.load %arg4[%c0_10, %c0_11, %c32] : memref<8x32x64xf32, #tpu.memory_space<vmem>>, vector<8x32x32xf32>
    tpu.vector_store %arg4[%c0_10, %c0_11, %c32], %13 {strides = array<i32>} : memref<8x32x64xf32, #tpu.memory_space<vmem>>, vector<8x32x32xf32>,
    return
  }
  func.func @transform_0(%arg0: i32) -> (i32, i32) {
    %c0_i32 = arith.constant 0 : i32
    %c0_i32_0 = arith.constant 0 : i32
    return %arg0, %c0_i32 : i32, i32
  }
  func.func @transform_1(%arg0: i32) -> (i32, i32) {
    %c0_i32 = arith.constant 0 : i32
    %c0_i32_0 = arith.constant 0 : i32
    %c0_i32_1 = arith.constant 0 : i32
    return %c0_i32, %c0_i32_0 : i32, i32
  }
  func.func @transform_2(%arg0: i32) -> (i32, i32) {
    %c0_i32 = arith.constant 0 : i32
    %c0_i32_0 = arith.constant 0 : i32
    %c0_i32_1 = arith.constant 0 : i32
    return %c0_i32, %c0_i32_0 : i32, i32
  }
  func.func @transform_3(%arg0: i32) -> (i32, i32, i32) {
    %c0_i32 = arith.constant 0 : i32
    %c0_i32_0 = arith.constant 0 : i32
    %c0_i32_1 = arith.constant 0 : i32
    return %arg0, %c0_i32, %c0_i32_0 : i32, i32, i32
  }
}

</mosaic_0001>

<bundles_post_ra>
// kernel: tpu_custom_call.1
= control target key start
LH: loop header
LB: loop body
LE: loop exit
PB: predicated region body
PF: predicated region fallthrough
CT: control target
= control target key end

     0   :  { %8 = vsyncpa [#allocation3], 0  ;;  %s1514_s0 = inlined_call_operand.vmem [shape: f32[512,10], index: 0, kind: input, shape index: {}]   ;;  %s1515_s1 = inlined_call_operand.vmem [shape: f32[10,32], index: 1, kind: input, shape index: {}]   ;;  %s1516_s2 = inlined_call_operand.vmem [shape: f32[1,32], index: 2, kind: input, shape index: {}]   ;;  %s1517_s3 = inlined_call_operand.hbm [shape: f32[16,32,64], index: 3, kind: output, shape index: {}]  }
   0x1   :  { %10 = vsyncpa [#allocation3 + $0x1], 0  ;;  %s1117_s12 = smov 0   ;;  %s1119_s13 = smov 0  }
   0x2   :  { %s1121_s14 = smov 0   ;;  %s1123_s15 = smov 0  }
   0x3 LB: > { %s1138_s16 = sadd.s32 4294967295, %s1091_s15   ;;  %s850_s17 = sadd.s32 4294967294, %s1091_s15   ;;  %s1091_s15 = sphi %s1123_s15, %s1523_s15   ;;  %s1087_s14 = sphi %s1121_s14, %s1522_s14   ;;  %s1083_s13 = sphi %s1119_s13, %s1521_s13   ;;  %s1079_s12 = sphi %s1117_s12, %s1520_s12  }
   0x4   : > { %s1142_s18 = sadd.s32 1, %s1091_s15   ;;  %s91_s19 = sadd.s32 1, %s1087_s14 }
   0x5   : > { %s88_s20 = ssub.s32 %s1091_s15, %s1142_s18  ;;  %p101_p0 = scmp.ne.s32.totalorder %s1087_s14, %s1083_s13 }
   0x6   : > { %p89_p1 = scmp.eq.s32.totalorder %s88_s20, 0  ;;  %p102_p2 = scmp.eq.s32.totalorder %s1138_s16, 1 }
   0x7   : > { %p107_p3 = scmp.ne.s32.totalorder %s1083_s13, %s1079_s12  ;;  %p108_p4 = scmp.eq.s32.totalorder %s850_s17, 1 }
   0x8   : > { %s1153_s21 = scalar_select %p89_p1, %s1087_s14, %s91_s19  }
   0x9   : > { %p1155_p5 = por %p102_p2, %p101_p0  ;;  %p1159_p6 = por %p108_p4, %p107_p3 }
   0xa   : > { %p853_p7 = scmp.ge.s32.totalorder %s1091_s15, 1  ;;  %p141_p8 = scmp.lt.s32.totalorder %s1091_s15, 3 }
   0xc   : > { %p142_p9 = pnand %p853_p7, %p141_p8 }
   0xd   : > { %s855_s28 = sshll.u32 (!%p142_p9), %s1138_s16, 5  ;;  %s162_s6 = sand.u32 (!%p142_p9), 1, %s1083_s13  }
   0xe   : > { %145 = sbr.rel (%p142_p9) target bundleno = 406 (0x196), region = 32  ;;  %p166_p10 = scmp.lt.s32.totalorder (!%p142_p9), %s855_s28, 63 }
   0xf   : > { %s854_s9 = sshll.u32 (!%p142_p9), %s162_s6, 8  ;;  %s1093_s11 = smov (!%p142_p9), 32  }
  0x10   : > { %s1253_s10 = scalar_lea.vmem (!%p142_p9), [#allocation2], %s854_s9  ;;  %s898_s17 = sshll.u32 (!%p142_p9), %s1138_s16, 12 }
  0x11   : > { %s788_s19 = sshll.u32 (!%p142_p9), %s1253_s10, 4  ;;  %s1460_s25 = scalar_lea.hbm (!%p142_p9), %s1517_s3, %s898_s17  ;;  %s1462_s19 = int_to_ptr.vmem [resolvable:$true] %s788_s19 }
  0x12   : > { %s1474_s16 = scalar_lea.sflag (!%p142_p9), [#allocation3], %s162_s6  ;;  %s1031_s26 = scalar_lea.vmem (!%p142_p9), %s1462_s19, 4096 }
  0x13   : > { %v205_v0 = vld [vmem:[%s1515_s1 + $0x8] sm:$0x3]  ;;  %vm310_vm0 = vcmask 1041408   ;;  %v204_v1 = vld [vmem:[%s1515_s1] sm:$0xff]  ;;  %s1525_s28 = smov (!%p166_p10, %s855_s28), 63  ;;  %vm213_vm1 = vcmask 80896   ;;  %p1032_p11 = scmp.ne.s32.totalorder %s1462_s19, %s1031_s26 }
  0x14   : > { %933 = vmatprep.subr.msk.mxu0 %vm310_vm0, %v205_v0  ;;  %985 = vmatprep.subr.msk.mxu1 %vm310_vm0, %v205_v0  ;;  %s856_s29 = sshll.u32 %s1525_s28, 3  ;;  %v1245_v34 = vld [vmem:[%s1516_s2] ss:$0 sm:$0xff]  ;;  %vm571_vm2 = vcmask 261120   ;;  %vm740_vm3 = vcmask 523520   ;;  %s1094_s27 = smov [#allocation2]  }
  0x15   : > { %934 = vmatpush3.msk.msra.mxu0 %vm310_vm0, %v205_v0  ;;  %987 = vmatpush3.msk.msra.mxu1 %vm310_vm0, %v205_v0  ;;  %s1175_s5 = scalar_lea.vmem %s1514_s0, %s856_s29  ;;  %p1033_p12 = pnand %p1032_p11, %p1155_p5 }
  0x16   : > { %935 = vmatprep.subr.mxu0 %v204_v1  ;;  %986 = vmatprep.subr.mxu1 %v204_v1  ;;  %v172_v2 = vld [vmem:[%s1175_s5] sm:$0xff]  ;;  %v173_v4 = vld [vmem:[%s1175_s5 + $0x8] sm:$0xff]  ;;  %v174_v6 = vld [vmem:[%s1175_s5 + $0x10] sm:$0xff]  ;;  %s1035_s28 = sshll.u32 %s1094_s27, 4  ;;  %s1036_s28 = int_to_ptr.vmem [resolvable:$false] %s1035_s28 }
  0x17   : > { %936 = vmatpush3.msra.mxu0 %v204_v1  ;;  %988 = vmatpush3.msra.mxu1 %v204_v1  ;;  %v188_v3 = vld [vmem:[%s1175_s5 + $0x80] sm:$0xff]  ;;  %v189_v5 = vld [vmem:[%s1175_s5 + $0x88] sm:$0xff]  ;;  %v190_v7 = vld [vmem:[%s1175_s5 + $0x90] sm:$0xff]  ;;  %p1034_p13 = pneg %p1033_p12  ;;  %s1037_s29 = scalar_lea.vmem %s1036_s28, 8192 }
  0x18   : > { %937 = vmatprep.mubr.msk.f32.mxu0 %vm213_vm1, %v172_v2  ;;  %961 = vmatprep.mubr.msk.f32.mxu1 %vm213_vm1, %v188_v3  ;;  %v175_v8 = vld [vmem:[%s1175_s5 + $0x18] sm:$0xff]  ;;  %v176_v10 = vld [vmem:[%s1175_s5 + $0x20] sm:$0xff]  ;;  %v177_v12 = vld [vmem:[%s1175_s5 + $0x28] sm:$0xff]  ;;  %p1038_p0 = scmp.lt.s32.totalorder %s1462_s19, %s1036_s28  ;;  %p1039_p1 = scmp.lt.s32.totalorder %s1037_s29, %s1031_s26 }
  0x19   : > { %938 = vmatmul.mubr.msk.f32.vlgmr.msra.gmra.mxu0 %vm213_vm1, %v173_v4  ;;  %962 = vmatmul.mubr.msk.f32.vlgmr.msra.gmra.mxu1 %vm213_vm1, %v189_v5  ;;  %v191_v9 = vld [vmem:[%s1175_s5 + $0x98] sm:$0xff]  ;;  %v192_v11 = vld [vmem:[%s1175_s5 + $0xa0] sm:$0xff]  ;;  %v193_v13 = vld [vmem:[%s1175_s5 + $0xa8] sm:$0xff] }
  0x1a   : > { %940 = vmatprep.mubr.msk.f32.mxu0 %vm213_vm1, %v174_v6  ;;  %964 = vmatprep.mubr.msk.f32.mxu1 %vm213_vm1, %v190_v7  ;;  %v178_v14 = vld [vmem:[%s1175_s5 + $0x30] sm:$0xff]  ;;  %v179_v16 = vld [vmem:[%s1175_s5 + $0x38] sm:$0xff]  ;;  %v180_v18 = vld [vmem:[%s1175_s5 + $0x40] sm:$0xff]  ;;  %p1040_p2 = por %p1039_p1, %p1038_p0 }
  0x1b   : > { %v194_v15 = vld [vmem:[%s1175_s5 + $0xb0] sm:$0xff]  ;;  %v195_v17 = vld [vmem:[%s1175_s5 + $0xb8] sm:$0xff]  ;;  %v196_v19 = vld [vmem:[%s1175_s5 + $0xc0] sm:$0xff] }
  0x1c   : > { %v181_v20 = vld [vmem:[%s1175_s5 + $0x48] sm:$0xff]  ;;  %v182_v22 = vld [vmem:[%s1175_s5 + $0x50] sm:$0xff]  ;;  %v183_v24 = vld [vmem:[%s1175_s5 + $0x58] sm:$0xff]  ;;  %p1041_p3 = pnand %p1040_p2, %p1034_p13 }
  0x1d   : > { %941 = vmatmul.mubr.msk.f32.gmra.mxu0 %vm213_vm1, %v175_v8  ;;  %965 = vmatmul.mubr.msk.f32.gmra.mxu1 %vm213_vm1, %v191_v9  ;;  %v197_v21 = vld [vmem:[%s1175_s5 + $0xc8] sm:$0xff]  ;;  %v198_v23 = vld [vmem:[%s1175_s5 + $0xd0] sm:$0xff]  ;;  %v199_v25 = vld [vmem:[%s1175_s5 + $0xd8] sm:$0xff] }
  0x1e   : > { %943 = vmatprep.mubr.msk.f32.mxu0 %vm213_vm1, %v176_v10  ;;  %967 = vmatprep.mubr.msk.f32.mxu1 %vm213_vm1, %v192_v11  ;;  %v184_v26 = vld [vmem:[%s1175_s5 + $0x60] sm:$0xff]  ;;  %v185_v28 = vld [vmem:[%s1175_s5 + $0x68] sm:$0xff]  ;;  %v186_v30 = vld [vmem:[%s1175_s5 + $0x70] sm:$0xff] }
  0x1f   : > { %v200_v27 = vld [vmem:[%s1175_s5 + $0xe0] sm:$0xff]  ;;  %v201_v29 = vld [vmem:[%s1175_s5 + $0xe8] sm:$0xff]  ;;  %v202_v31 = vld [vmem:[%s1175_s5 + $0xf0] sm:$0xff] }
  0x20   : > { %v187_v32 = vld [vmem:[%s1175_s5 + $0x78] sm:$0xff] }
  0x21   : > { %944 = vmatmul.mubr.msk.f32.gmra.mxu0 %vm213_vm1, %v177_v12  ;;  %968 = vmatmul.mubr.msk.f32.gmra.mxu1 %vm213_vm1, %v193_v13  ;;  %v203_v33 = vld [vmem:[%s1175_s5 + $0xf8] sm:$0xff] }
  0x22   : > { %946 = vmatprep.mubr.msk.f32.mxu0 %vm213_vm1, %v178_v14  ;;  %970 = vmatprep.mubr.msk.f32.mxu1 %vm213_vm1, %v194_v15 }
  0x25   : > { %947 = vmatmul.mubr.msk.f32.gmra.mxu0 %vm213_vm1, %v179_v16  ;;  %971 = vmatmul.mubr.msk.f32.gmra.mxu1 %vm213_vm1, %v195_v17 }
  0x26   : > { %949 = vmatprep.mubr.msk.f32.mxu0 %vm213_vm1, %v180_v18  ;;  %973 = vmatprep.mubr.msk.f32.mxu1 %vm213_vm1, %v196_v19 }
  0x29   : > { %950 = vmatmul.mubr.msk.f32.gmra.mxu0 %vm213_vm1, %v181_v20  ;;  %974 = vmatmul.mubr.msk.f32.gmra.mxu1 %vm213_vm1, %v197_v21 }
  0x2a   : > { %952 = vmatprep.mubr.msk.f32.mxu0 %vm213_vm1, %v182_v22  ;;  %976 = vmatprep.mubr.msk.f32.mxu1 %vm213_vm1, %v198_v23 }
  0x2d   : > { %953 = vmatmul.mubr.msk.f32.gmra.mxu0 %vm213_vm1, %v183_v24  ;;  %977 = vmatmul.mubr.msk.f32.gmra.mxu1 %vm213_vm1, %v199_v25 }
  0x2e   : > { %955 = vmatprep.mubr.msk.f32.mxu0 %vm213_vm1, %v184_v26  ;;  %979 = vmatprep.mubr.msk.f32.mxu1 %vm213_vm1, %v200_v27 }
  0x31   : > { %956 = vmatmul.mubr.msk.f32.gmra.mxu0 %vm213_vm1, %v185_v28  ;;  %980 = vmatmul.mubr.msk.f32.gmra.mxu1 %vm213_vm1, %v201_v29 }
  0x32   : > { %958 = vmatprep.mubr.msk.f32.mxu0 %vm213_vm1, %v186_v30  ;;  %982 = vmatprep.mubr.msk.f32.mxu1 %vm213_vm1, %v202_v31 }
  0x35   : > { %959 = vmatmul.mubr.msk.f32.gmra.mxu0 %vm213_vm1, %v187_v32  ;;  %983 = vmatmul.mubr.msk.f32.gmra.mxu1 %vm213_vm1, %v203_v33 }
  0xd9   : > { %v939_v35 = vpop.f32.mrf.mxu0  ;;  %v963_v36 = vpop.f32.mrf.mxu1 }
  0xda   : > { %v386_v37 = vadd.f32 %v939_v35, %v1245_v34  ;;  %v466_v38 = vadd.f32 %v963_v36, %v1245_v34 }
  0xdb   : > { %v380_v39 = vpop.f32.mrf.mxu0  ;;  %v460_v40 = vpop.f32.mrf.mxu1 }
  0xdc   : > { %v540_v41 = vmax.f32 %v386_v37, 0.0  ;;  %v556_v42 = vmax.f32 %v466_v38, 0.0  ;;  %v381_v43 = vadd.f32 %v1245_v34, %v380_v39  ;;  %v461_v44 = vadd.f32 %v1245_v34, %v460_v40 }
  0xdd   : > { %v942_v45 = vpop.f32.mrf.mxu0  ;;  %v966_v46 = vpop.f32.mrf.mxu1 }
  0xde   : > { %677 = vst.msk [vmem:[%s1253_s10 + $0x8] sm:$0xff] %vm571_vm2, %v540_v41  ;;  %v625_v47 = vsel %vm571_vm2, %v556_v42, -inf  ;;  %693 = vst.msk [vmem:[%s1253_s10 + $0x88] sm:$0xff] %vm571_vm2, %v556_v42  ;;  %v539_v48 = vmax.f32 %v381_v43, 0.0  ;;  %v555_v49 = vmax.f32 %v461_v44, 0.0  ;;  %v396_v50 = vadd.f32 %v942_v45, %v1245_v34 }
  0xdf   : > { %v476_v51 = vadd.f32 %v966_v46, %v1245_v34  ;;  %v390_v52 = vpop.f32.mrf.mxu0  ;;  %v470_v53 = vpop.f32.mrf.mxu1  ;;  %v573_v58 = vsel %vm571_vm2, %v540_v41, -inf }
  0xe0   : > { %v572_v54 = vsel %vm571_vm2, %v539_v48, -inf  ;;  %676 = vst.msk [vmem:[%s1253_s10] sm:$0xff] %vm571_vm2, %v539_v48  ;;  %v624_v55 = vsel %vm571_vm2, %v555_v49, -inf  ;;  %692 = vst.msk [vmem:[%s1253_s10 + $0x80] sm:$0xff] %vm571_vm2, %v555_v49  ;;  %v391_v56 = vadd.f32 %v1245_v34, %v390_v52  ;;  %v471_v57 = vadd.f32 %v1245_v34, %v470_v53 }
  0xe1   : > { %v626_v59 = vmax.f32 %v624_v55, %v625_v47  ;;  %v542_v60 = vmax.f32 %v396_v50, 0.0  ;;  %v558_v61 = vmax.f32 %v476_v51, 0.0  ;;  %v945_v62 = vpop.f32.mrf.mxu0  ;;  %v969_v63 = vpop.f32.mrf.mxu1  ;;  %v574_v4 = vmax.f32 %v572_v54, %v573_v58 }
  0xe2   : > { %v541_v0 = vmax.f32 %v391_v56, 0.0  ;;  %v557_v1 = vmax.f32 %v471_v57, 0.0  ;;  %v406_v2 = vadd.f32 %v945_v62, %v1245_v34  ;;  %v486_v3 = vadd.f32 %v969_v63, %v1245_v34 }
  0xe3   : > { %679 = vst.msk [vmem:[%s1253_s10 + $0x18] sm:$0xff] %vm571_vm2, %v542_v60  ;;  %v629_v5 = vsel %vm571_vm2, %v558_v61, -inf  ;;  %695 = vst.msk [vmem:[%s1253_s10 + $0x98] sm:$0xff] %vm571_vm2, %v558_v61  ;;  %v400_v6 = vpop.f32.mrf.mxu0  ;;  %v480_v7 = vpop.f32.mrf.mxu1  ;;  %v577_v18 = vsel %vm571_vm2, %v542_v60, -inf }
  0xe4   : > { %v575_v8 = vsel %vm571_vm2, %v541_v0, -inf  ;;  %678 = vst.msk [vmem:[%s1253_s10 + $0x10] sm:$0xff] %vm571_vm2, %v541_v0  ;;  %v627_v9 = vsel %vm571_vm2, %v557_v1, -inf  ;;  %694 = vst.msk [vmem:[%s1253_s10 + $0x90] sm:$0xff] %vm571_vm2, %v557_v1  ;;  %v544_v10 = vmax.f32 %v406_v2, 0.0  ;;  %v560_v11 = vmax.f32 %v486_v3, 0.0 }
  0xe5   : > { %v576_v12 = vmax.f32 %v574_v4, %v575_v8  ;;  %v628_v13 = vmax.f32 %v626_v59, %v627_v9  ;;  %v401_v14 = vadd.f32 %v1245_v34, %v400_v6  ;;  %v481_v15 = vadd.f32 %v1245_v34, %v480_v7  ;;  %v948_v16 = vpop.f32.mrf.mxu0  ;;  %v972_v17 = vpop.f32.mrf.mxu1 }
  0xe6   : > { %681 = vst.msk [vmem:[%s1253_s10 + $0x28] sm:$0xff] %vm571_vm2, %v544_v10  ;;  %v638_v19 = vsel %vm571_vm2, %v560_v11, -inf  ;;  %697 = vst.msk [vmem:[%s1253_s10 + $0xa8] sm:$0xff] %vm571_vm2, %v560_v11  ;;  %v416_v20 = vadd.f32 %v948_v16, %v1245_v34  ;;  %v496_v21 = vadd.f32 %v972_v17, %v1245_v34  ;;  %v586_v32 = vsel %vm571_vm2, %v544_v10, -inf }
  0xe7   : > { %v578_v22 = vmax.f32 %v576_v12, %v577_v18  ;;  %v630_v23 = vmax.f32 %v628_v13, %v629_v5  ;;  %v543_v24 = vmax.f32 %v401_v14, 0.0  ;;  %v559_v25 = vmax.f32 %v481_v15, 0.0  ;;  %v410_v26 = vpop.f32.mrf.mxu0  ;;  %v490_v27 = vpop.f32.mrf.mxu1 }
  0xe8   : > { %v546_v28 = vmax.f32 %v416_v20, 0.0  ;;  %v562_v29 = vmax.f32 %v496_v21, 0.0  ;;  %v411_v30 = vadd.f32 %v1245_v34, %v410_v26  ;;  %v491_v31 = vadd.f32 %v1245_v34, %v490_v27 }
  0xe9   : > { %v585_v33 = vsel %vm571_vm2, %v543_v24, -inf  ;;  %680 = vst.msk [vmem:[%s1253_s10 + $0x20] sm:$0xff] %vm571_vm2, %v543_v24  ;;  %v637_v35 = vsel %vm571_vm2, %v559_v25, -inf  ;;  %696 = vst.msk [vmem:[%s1253_s10 + $0xa0] sm:$0xff] %vm571_vm2, %v559_v25  ;;  %v951_v36 = vpop.f32.mrf.mxu0  ;;  %v975_v37 = vpop.f32.mrf.mxu1  ;;  %v631_v38 = vrot.slane %v630_v23, 4  ;;  %v579_v41 = vrot.slane %v578_v22, 4 }
  0xea   : > { %v587_v39 = vmax.f32 %v585_v33, %v586_v32  ;;  %v639_v40 = vmax.f32 %v637_v35, %v638_v19  ;;  %683 = vst.msk [vmem:[%s1253_s10 + $0x38] sm:$0xff] %vm571_vm2, %v546_v28  ;;  %699 = vst.msk [vmem:[%s1253_s10 + $0xb8] sm:$0xff] %vm571_vm2, %v562_v29  ;;  %v545_v42 = vmax.f32 %v411_v30, 0.0  ;;  %v561_v43 = vmax.f32 %v491_v31, 0.0 }
  0xeb   : > { %v426_v44 = vadd.f32 %v951_v36, %v1245_v34  ;;  %v506_v45 = vadd.f32 %v975_v37, %v1245_v34  ;;  %v420_v46 = vpop.f32.mrf.mxu0  ;;  %v500_v47 = vpop.f32.mrf.mxu1  ;;  %v590_v48 = vsel %vm571_vm2, %v546_v28, -inf  ;;  %v642_v49 = vsel %vm571_vm2, %v562_v29, -inf }
  0xec   : > { %v421_v50 = vadd.f32 %v1245_v34, %v420_v46  ;;  %v501_v51 = vadd.f32 %v1245_v34, %v500_v47  ;;  %v588_v52 = vsel %vm571_vm2, %v545_v42, -inf  ;;  %682 = vst.msk [vmem:[%s1253_s10 + $0x30] sm:$0xff] %vm571_vm2, %v545_v42  ;;  %v640_v53 = vsel %vm571_vm2, %v561_v43, -inf  ;;  %698 = vst.msk [vmem:[%s1253_s10 + $0xb0] sm:$0xff] %vm571_vm2, %v561_v43 }
  0xed   : > { %v548_v54 = vmax.f32 %v426_v44, 0.0  ;;  %v564_v55 = vmax.f32 %v506_v45, 0.0  ;;  %v954_v56 = vpop.f32.mrf.mxu0  ;;  %v978_v57 = vpop.f32.mrf.mxu1  ;;  %v589_v58 = vmax.f32 %v587_v39, %v588_v52  ;;  %v641_v59 = vmax.f32 %v639_v40, %v640_v53 }
  0xee   : > { %v547_v60 = vmax.f32 %v421_v50, 0.0  ;;  %v563_v61 = vmax.f32 %v501_v51, 0.0  ;;  %v436_v62 = vadd.f32 %v954_v56, %v1245_v34  ;;  %v516_v63 = vadd.f32 %v978_v57, %v1245_v34 }
  0xef   : > { %685 = vst.msk [vmem:[%s1253_s10 + $0x48] sm:$0xff] %vm571_vm2, %v548_v54  ;;  %701 = vst.msk [vmem:[%s1253_s10 + $0xc8] sm:$0xff] %vm571_vm2, %v564_v55  ;;  %v430_v0 = vpop.f32.mrf.mxu0  ;;  %v510_v1 = vpop.f32.mrf.mxu1  ;;  %v580_v2 = vmax.f32 %v578_v22, %v579_v41  ;;  %v1325_v3 = vmax.f32 %v630_v23, %v631_v38  ;;  %v1327_v4 = vmax.f32 %v589_v58, %v590_v48  ;;  %v651_v5 = vsel %vm571_vm2, %v564_v55, -inf }
  0xf0   : > { %v598_v6 = vsel %vm571_vm2, %v547_v60, -inf  ;;  %684 = vst.msk [vmem:[%s1253_s10 + $0x40] sm:$0xff] %vm571_vm2, %v547_v60  ;;  %v650_v7 = vsel %vm571_vm2, %v563_v61, -inf  ;;  %700 = vst.msk [vmem:[%s1253_s10 + $0xc0] sm:$0xff] %vm571_vm2, %v563_v61  ;;  %v1336_v8 = vmax.f32 %v641_v59, %v642_v49  ;;  %v599_v9 = vsel %vm571_vm2, %v548_v54, -inf }
  0xf1   : > { %v550_v10 = vmax.f32 %v436_v62, 0.0  ;;  %v566_v11 = vmax.f32 %v516_v63, 0.0  ;;  %v957_v12 = vpop.f32.mrf.mxu0  ;;  %v981_v13 = vpop.f32.mrf.mxu1  ;;  %v600_v14 = vmax.f32 %v598_v6, %v599_v9  ;;  %v431_v15 = vadd.f32 %v1245_v34, %v430_v0 }
  0xf2   : > { %v511_v16 = vadd.f32 %v1245_v34, %v510_v1  ;;  %v446_v17 = vadd.f32 %v957_v12, %v1245_v34  ;;  %v592_v18 = vrot.slane %v1327_v4, 4  ;;  %v652_v19 = vmax.f32 %v650_v7, %v651_v5 }
  0xf3   : > { %687 = vst.msk [vmem:[%s1253_s10 + $0x58] sm:$0xff] %vm571_vm2, %v550_v10  ;;  %703 = vst.msk [vmem:[%s1253_s10 + $0xd8] sm:$0xff] %vm571_vm2, %v566_v11  ;;  %v526_v20 = vadd.f32 %v981_v13, %v1245_v34  ;;  %v440_v21 = vpop.f32.mrf.mxu0  ;;  %v520_v22 = vpop.f32.mrf.mxu1  ;;  %v581_v23 = vrot.slane %v580_v2, 2  ;;  %v549_v24 = vmax.f32 %v431_v15, 0.0  ;;  %v603_v28 = vsel %vm571_vm2, %v550_v10, -inf }
  0xf4   : > { %v565_v25 = vmax.f32 %v511_v16, 0.0  ;;  %v552_v26 = vmax.f32 %v446_v17, 0.0  ;;  %v441_v27 = vadd.f32 %v1245_v34, %v440_v21  ;;  %v521_v30 = vadd.f32 %v1245_v34, %v520_v22 }
  0xf5   : > { %v568_v29 = vmax.f32 %v526_v20, 0.0  ;;  %v960_v31 = vpop.f32.mrf.mxu0  ;;  %v984_v32 = vpop.f32.mrf.mxu1  ;;  %v582_v33 = vmax.f32 %v580_v2, %v581_v23  ;;  %v655_v35 = vsel %vm571_vm2, %v566_v11, -inf  ;;  %v601_v36 = vsel %vm571_vm2, %v549_v24, -inf  ;;  %686 = vst.msk [vmem:[%s1253_s10 + $0x50] sm:$0xff] %vm571_vm2, %v549_v24 }
  0xf6   : > { %v653_v37 = vsel %vm571_vm2, %v565_v25, -inf  ;;  %702 = vst.msk [vmem:[%s1253_s10 + $0xd0] sm:$0xff] %vm571_vm2, %v565_v25  ;;  %689 = vst.msk [vmem:[%s1253_s10 + $0x68] sm:$0xff] %vm571_vm2, %v552_v26  ;;  %v551_v38 = vmax.f32 %v441_v27, 0.0  ;;  %v602_v39 = vmax.f32 %v600_v14, %v601_v36  ;;  %v567_v41 = vmax.f32 %v521_v30, 0.0 }
  0xf7   : > { %v654_v40 = vmax.f32 %v652_v19, %v653_v37  ;;  %705 = vst.msk [vmem:[%s1253_s10 + $0xe8] sm:$0xff] %vm571_vm2, %v568_v29  ;;  %v633_v42 = vrot.slane %v1325_v3, 2  ;;  %v664_v43 = vsel %vm571_vm2, %v568_v29, -inf  ;;  %v456_v44 = vadd.f32 %v960_v31, %v1245_v34  ;;  %v450_v47 = vpop.f32.mrf.mxu0  ;;  %v530_v48 = vpop.f32.mrf.mxu1 }
  0xf8   : > { %688 = vst.msk [vmem:[%s1253_s10 + $0x60] sm:$0xff] %vm571_vm2, %v551_v38  ;;  %v536_v45 = vadd.f32 %v984_v32, %v1245_v34  ;;  %v583_v46 = vrot.slane %v582_v33, 1  ;;  %v604_v49 = vmax.f32 %v602_v39, %v603_v28  ;;  %v611_v51 = vsel %vm571_vm2, %v551_v38, -inf  ;;  %704 = vst.msk [vmem:[%s1253_s10 + $0xe0] sm:$0xff] %vm571_vm2, %v567_v41 }
  0xf9   : > { %v656_v50 = vmax.f32 %v654_v40, %v655_v35  ;;  %v663_v52 = vsel %vm571_vm2, %v567_v41, -inf  ;;  %v612_v53 = vsel %vm571_vm2, %v552_v26, -inf  ;;  %v554_v54 = vmax.f32 %v456_v44, 0.0 }
  0xfa   : > { %v570_v55 = vmax.f32 %v536_v45, 0.0  ;;  %v584_v56 = vmax.f32 %v582_v33, %v583_v46  ;;  %v605_v57 = vrot.slane %v604_v49, 4  ;;  %v451_v59 = vadd.f32 %v1245_v34, %v450_v47 }
  0xfb   : > { %v657_v58 = vrot.slane %v656_v50, 4  ;;  %v531_v60 = vadd.f32 %v1245_v34, %v530_v48  ;;  %v613_v61 = vmax.f32 %v611_v51, %v612_v53  ;;  %v665_v62 = vmax.f32 %v663_v52, %v664_v43  ;;  %691 = vst.msk [vmem:[%s1253_s10 + $0x78] sm:$0xff] %vm571_vm2, %v554_v54 }
  0xfc   : > { %707 = vst.msk [vmem:[%s1253_s10 + $0xf8] sm:$0xff] %vm571_vm2, %v570_v55  ;;  %716 = vrot.lane.b32.xlu0 %v584_v56, %s1093_s11  ;;  %v634_v63 = vmax.f32 %v1325_v3, %v633_v42  ;;  %v644_v0 = vrot.slane %v1336_v8, 4  ;;  %v553_v1 = vmax.f32 %v451_v59, 0.0  ;;  %v593_v5 = vmax.f32 %v1327_v4, %v592_v18 }
  0xfd   : > { %v569_v2 = vmax.f32 %v531_v60, 0.0  ;;  %v606_v34 = vmax.f32 %v604_v49, %v605_v57  ;;  %v668_v6 = vsel %vm571_vm2, %v570_v55, -inf  ;;  %v658_v10 = vmax.f32 %v656_v50, %v657_v58 }
  0xfe   : > { %v635_v7 = vrot.slane %v634_v63, 1  ;;  %v645_v9 = vmax.f32 %v1336_v8, %v644_v0  ;;  %v614_v11 = vsel %vm571_vm2, %v553_v1, -inf  ;;  %690 = vst.msk [vmem:[%s1253_s10 + $0x70] sm:$0xff] %vm571_vm2, %v553_v1  ;;  %v594_v3 = vrot.slane %v593_v5, 2 }
  0xff   : > { %v666_v12 = vsel %vm571_vm2, %v569_v2, -inf  ;;  %706 = vst.msk [vmem:[%s1253_s10 + $0xf0] sm:$0xff] %vm571_vm2, %v569_v2  ;;  %v607_v13 = vrot.slane %v606_v34, 2  ;;  %v615_v14 = vmax.f32 %v613_v61, %v614_v11  ;;  %v616_v17 = vsel %vm571_vm2, %v554_v54, -inf }
 0x100   : > { %v667_v15 = vmax.f32 %v665_v62, %v666_v12  ;;  %v636_v4 = vmax.f32 %v634_v63, %v635_v7  ;;  %v646_v16 = vrot.slane %v645_v9, 2  ;;  %v595_v18 = vmax.f32 %v593_v5, %v594_v3 }
 0x101   : > { %v608_v19 = vmax.f32 %v606_v34, %v607_v13  ;;  %v659_v8 = vrot.slane %v658_v10, 2  ;;  %v617_v20 = vmax.f32 %v615_v14, %v616_v17 }
 0x102   : > { %v669_v21 = vmax.f32 %v667_v15, %v668_v6  ;;  %724 = vrot.lane.b32.xlu0 %v636_v4, %s1093_s11  ;;  %v647_v22 = vmax.f32 %v645_v9, %v646_v16  ;;  %v596_v23 = vrot.slane %v595_v18, 1 }
 0x103   : > { %v660_v24 = vmax.f32 %v658_v10, %v659_v8  ;;  %v618_v25 = vrot.slane %v617_v20, 4  ;;  %v609_v28 = vrot.slane %v608_v19, 1 }
 0x104   : > { %v670_v26 = vrot.slane %v669_v21, 4  ;;  %v648_v27 = vrot.slane %v647_v22, 1  ;;  %v597_v29 = vmax.f32 %v595_v18, %v596_v23 }
 0x105   : > { %v661_v30 = vrot.slane %v660_v24, 1  ;;  %v619_v32 = vmax.f32 %v617_v20, %v618_v25  ;;  %v610_v36 = vmax.f32 %v608_v19, %v609_v28 }
 0x106   : > { %v649_v31 = vmax.f32 %v647_v22, %v648_v27  ;;  %v671_v33 = vmax.f32 %v669_v21, %v670_v26  ;;  %718 = vrot.lane.b32.xlu0 %v597_v29, %s1093_s11 }
 0x107   : > { %v662_v35 = vmax.f32 %v660_v24, %v661_v30  ;;  %v620_v37 = vrot.slane %v619_v32, 2 }
 0x108   : > { %726 = vrot.lane.b32.xlu1 %v649_v31, %s1093_s11  ;;  %v672_v38 = vrot.slane %v671_v33, 2 }
 0x109   : > { %v621_v39 = vmax.f32 %v619_v32, %v620_v37 }
 0x10a   : > { %v673_v40 = vmax.f32 %v671_v33, %v672_v38  ;;  %728 = vrot.lane.b32.xlu0 %v662_v35, %s1093_s11 }
 0x10b   : > { %v622_v41 = vrot.slane %v621_v39, 1 }
 0x10c   : > { %720 = vrot.lane.b32.xlu1 %v610_v36, %s1093_s11  ;;  %v674_v43 = vrot.slane %v673_v40, 1 }
 0x10d   : > { %v623_v42 = vmax.f32 %v621_v39, %v622_v41 }
 0x10e   : > { %v675_v44 = vmax.f32 %v673_v40, %v674_v43 }
 0x110   : > { %722 = vrot.lane.b32.xlu1 %v623_v42, %s1093_s11 }
 0x114   : > { %730 = vrot.lane.b32.xlu1 %v675_v44, %s1093_s11 }
 0x16e   : > { %v717_v45 = vpop.permute.xlu0 %716 }
 0x16f   : > { %741 = vst.msk [vmem:[%s1253_s10] sm:$0xff] %vm740_vm3, %v717_v45  ;;  %742 = vst.msk [vmem:[%s1253_s10 + $0x8] sm:$0xff] %vm740_vm3, %v717_v45 }
 0x170   : > { %743 = vst.msk [vmem:[%s1253_s10 + $0x10] sm:$0xff] %vm740_vm3, %v717_v45  ;;  %744 = vst.msk [vmem:[%s1253_s10 + $0x18] sm:$0xff] %vm740_vm3, %v717_v45 }
 0x174   : > { %v725_v46 = vpop.permute.xlu0 %724 }
 0x175   : > { %757 = vst.msk [vmem:[%s1253_s10 + $0x80] sm:$0xff] %vm740_vm3, %v725_v46  ;;  %758 = vst.msk [vmem:[%s1253_s10 + $0x88] sm:$0xff] %vm740_vm3, %v725_v46 }
 0x176   : > { %759 = vst.msk [vmem:[%s1253_s10 + $0x90] sm:$0xff] %vm740_vm3, %v725_v46  ;;  %760 = vst.msk [vmem:[%s1253_s10 + $0x98] sm:$0xff] %vm740_vm3, %v725_v46 }
 0x178   : > { %v719_v47 = vpop.permute.xlu0 %718 }
 0x179   : > { %745 = vst.msk [vmem:[%s1253_s10 + $0x20] sm:$0xff] %vm740_vm3, %v719_v47  ;;  %746 = vst.msk [vmem:[%s1253_s10 + $0x28] sm:$0xff] %vm740_vm3, %v719_v47 }
 0x17a   : > { %v727_v48 = vpop.permute.xlu1 %726  ;;  %747 = vst.msk [vmem:[%s1253_s10 + $0x30] sm:$0xff] %vm740_vm3, %v719_v47  ;;  %748 = vst.msk [vmem:[%s1253_s10 + $0x38] sm:$0xff] %vm740_vm3, %v719_v47 }
 0x17b   : > { %761 = vst.msk [vmem:[%s1253_s10 + $0xa0] sm:$0xff] %vm740_vm3, %v727_v48  ;;  %762 = vst.msk [vmem:[%s1253_s10 + $0xa8] sm:$0xff] %vm740_vm3, %v727_v48 }
 0x17c   : > { %763 = vst.msk [vmem:[%s1253_s10 + $0xb0] sm:$0xff] %vm740_vm3, %v727_v48  ;;  %764 = vst.msk [vmem:[%s1253_s10 + $0xb8] sm:$0xff] %vm740_vm3, %v727_v48  ;;  %v729_v49 = vpop.permute.xlu0 %728 }
 0x17d   : > { %765 = vst.msk [vmem:[%s1253_s10 + $0xc0] sm:$0xff] %vm740_vm3, %v729_v49  ;;  %766 = vst.msk [vmem:[%s1253_s10 + $0xc8] sm:$0xff] %vm740_vm3, %v729_v49 }
 0x17e   : > { %v721_v50 = vpop.permute.xlu1 %720  ;;  %767 = vst.msk [vmem:[%s1253_s10 + $0xd0] sm:$0xff] %vm740_vm3, %v729_v49  ;;  %768 = vst.msk [vmem:[%s1253_s10 + $0xd8] sm:$0xff] %vm740_vm3, %v729_v49 }
 0x17f   : > { %749 = vst.msk [vmem:[%s1253_s10 + $0x40] sm:$0xff] %vm740_vm3, %v721_v50  ;;  %750 = vst.msk [vmem:[%s1253_s10 + $0x48] sm:$0xff] %vm740_vm3, %v721_v50 }
 0x180   : > { %751 = vst.msk [vmem:[%s1253_s10 + $0x50] sm:$0xff] %vm740_vm3, %v721_v50  ;;  %752 = vst.msk [vmem:[%s1253_s10 + $0x58] sm:$0xff] %vm740_vm3, %v721_v50 }
 0x182   : > { %v723_v51 = vpop.permute.xlu1 %722 }
 0x183   : > { %753 = vst.msk [vmem:[%s1253_s10 + $0x60] sm:$0xff] %vm740_vm3, %v723_v51  ;;  %754 = vst.msk [vmem:[%s1253_s10 + $0x68] sm:$0xff] %vm740_vm3, %v723_v51 }
 0x184   : > { %755 = vst.msk [vmem:[%s1253_s10 + $0x70] sm:$0xff] %vm740_vm3, %v723_v51  ;;  %756 = vst.msk [vmem:[%s1253_s10 + $0x78] sm:$0xff] %vm740_vm3, %v723_v51 }
 0x186   : > { %v731_v52 = vpop.permute.xlu1 %730 }
 0x187   : > { %769 = vst.msk [vmem:[%s1253_s10 + $0xe0] sm:$0xff] %vm740_vm3, %v731_v52  ;;  %770 = vst.msk [vmem:[%s1253_s10 + $0xe8] sm:$0xff] %vm740_vm3, %v731_v52 }
 0x188   : > { %771 = vst.msk [vmem:[%s1253_s10 + $0xf0] sm:$0xff] %vm740_vm3, %v731_v52  ;;  %772 = vst.msk [vmem:[%s1253_s10 + $0xf8] sm:$0xff] %vm740_vm3, %v731_v52 }
 0x189   : > { %1044 = shalt.err (!%p1041_p3)
}
 0x18a   : > { %s1045_s30 = scalar_lea.hbm %s1460_s25, 4096  ;;  %s1049_s6 = scalar_lea.hbm %s1517_s3, 8192 }
 0x18b   : > { %p1046_p4 = scmp.ne.s32.totalorder %s1460_s25, %s1045_s30  ;;  %p1050_p9 = scmp.lt.s32.totalorder %s1460_s25, %s1517_s3 }
 0x18c   : > { %p1051_p10 = scmp.lt.s32.totalorder %s1049_s6, %s1045_s30 }
 0x18d   : > { %p1047_p7 = pnand %p1046_p4, %p1155_p5 }
 0x18e   : > { %p1052_p11 = por %p1051_p10, %p1050_p9 }
 0x18f   : > { %p1048_p8 = pneg %p1047_p7 }
 0x191   : > { %p1053_p12 = pnand %p1052_p11, %p1048_p8 }
 0x193   : > { %1056 = shalt.err (!%p1053_p12)
}
 0x194   : > { %s1095_s9 = smov 128   ;;  %s1096_s10 = smov 8  }
 0x195   : > { %989 = dma.vmem_to_hbm [thread:$0]  (%p1155_p5), %s1462_s19, 4096, %s1460_s25, %s1474_s16, %s1095_s9, %s1095_s9, %s1096_s10  }
 0x196 PF: > { %p995_p13 = scmp.ge.s32.totalorder %s1091_s15, 2  ;;  %s803_s11 = sand.u32 1, %s1079_s12  }
 0x197   : > { %s804_s17 = scalar_lea.sflag [#allocation3], %s803_s11 }
 0x198   : > { %p992_p0 = pnand %p995_p13, %p1159_p6 }
 0x19a   : > { %p993_p1 = pneg %p992_p0 }
 0x19c   : > { %1074 = dma.done.wait (%p993_p1), %s804_s17, 4096  }
 0x19d   : > { %1076 = vsyncadd (%p993_p1), %s804_s17, 4294963200  ;;  %p13_p2 = scmp.ge.s32.totalorder %s1142_s18, 4   ;;  %s1520_s12 = smov %s1083_s13 }
 0x19e   : > { %s1521_s13 = smov %s1087_s14  ;;  %s1522_s14 = smov %s1153_s21 }
 0x19f   : > { %s1523_s15 = smov %s1142_s18  ;;  %15 = sbr.rel (!%p13_p2) target bundleno = 3 (0x3), region = 67 }
 0x1a4   :  { %809 = vsyncpa [#allocation3], 1 }
 0x1a5   :  { %811 = vsyncpa [#allocation3 + $0x1], 1 }

</bundles_post_ra>
